<compile_context>
chip_gen: v7x
topology: tpu7x:2x2x1
jax: 0.10.0
libtpu: 0.0.40
codegen_flags: <defaults>
</compile_context>

<pallas_src>
import jax
import jax.numpy as jnp
from jax.experimental import pallas as pl
from jax.experimental.pallas import tpu as pltpu


def _channel_attn_kernel(w_ref, x_ref, o_ref):
    # w_ref: (C_out, C_in)  weight, constant block index -> resident in VMEM
    # x_ref: (C_in, T_HW)   lane-dense activation tile (spatial on lanes)
    # o_ref: (C_out, T_HW)  lane-dense output tile (unmasked stores)
    o_ref[...] = jnp.dot(
        w_ref[...], x_ref[...], preferred_element_type=jnp.float32
    ).astype(o_ref.dtype)


def _choose_spatial_tile(hw, c_in, c_out, dtype_bytes,
                         vmem_budget_bytes=24 * 1024 * 1024):
    """Largest lane tile (multiple of 128) whose double-buffered in+out tiles
    fit in a conservative VMEM budget (sized with v7x's 64 MiB VMEM in mind)."""
    per_lane = 2 * (c_in + c_out) * dtype_bytes      # 2 buffers x (in + out)
    max_lanes = max(128, vmem_budget_bytes // max(per_lane, 1))
    t = min(max_lanes, 8192)                         # diminishing returns past ~8K lanes
    t = max(128, (t // 128) * 128)                   # lane-dense: multiple of 128
    hw_ceil = ((hw + 127) // 128) * 128              # never tile beyond padded extent
    return min(t, hw_ceil)


def channel_attention_forward(x_nchw, weights):
    """1x1 conv (no bias), matching torch.nn.functional.conv2d(x, weights).

    x_nchw:  (N, C_in, H, W)
    weights: (C_out, C_in, 1, 1)
    returns: (N, C_out, H, W)
    """
    n, c_in, h, w = x_nchw.shape
    c_out = weights.shape[0]
    assert weights.shape == (c_out, c_in, 1, 1)

    hw = h * w
    dtype = x_nchw.dtype
    dtype_bytes = jnp.dtype(dtype).itemsize

    # Pure reshapes — no transposes, no extra HBM traffic.
    x3d = x_nchw.reshape(n, c_in, hw)                  # (N, C_in, HW)
    w2d = weights.reshape(c_out, c_in).astype(dtype)   # (C_out, C_in)

    # Pick a large lane tile; pad HW up to a tile multiple (kills the old
    # "tm = m" single-giant-block fallback for non-128-aligned sizes).
    t_hw = _choose_spatial_tile(hw, c_in, c_out, dtype_bytes)
    hw_pad = ((hw + t_hw - 1) // t_hw) * t_hw
    if hw_pad != hw:
        x3d = jnp.pad(x3d, ((0, 0), (0, 0), (0, hw_pad - hw)))

    grid = (n, hw_pad // t_hw)

    cost = pl.CostEstimate(
        flops=2 * n * hw_pad * c_in * c_out,
        transcendentals=0,
        bytes_accessed=(n * hw_pad * (c_in + c_out) + c_in * c_out) * dtype_bytes,
    )

    out3d = pl.pallas_call(
        _channel_attn_kernel,
        out_shape=jax.ShapeDtypeStruct((n, c_out, hw_pad), dtype),
        grid_spec=pltpu.PrefetchScalarGridSpec(
            num_scalar_prefetch=0,
            grid=grid,
            in_specs=[
                # Tiny weight: constant block index across the whole grid, so
                # it is DMA'd once and stays resident in VMEM.
                pl.BlockSpec((c_out, c_in), lambda b, j: (0, 0)),
                # Activation: batch dim squeezed, spatial dim on the lanes.
                pl.BlockSpec((None, c_in, t_hw), lambda b, j: (b, 0, j)),
            ],
            out_specs=pl.BlockSpec((None, c_out, t_hw), lambda b, j: (b, 0, j)),
        ),
        compiler_params=pltpu.CompilerParams(
            dimension_semantics=("parallel", "parallel"),
            vmem_limit_bytes=32 * 1024 * 1024,
        ),
        cost_estimate=cost,
    )(w2d, x3d)

    if hw_pad != hw:
        out3d = out3d[:, :, :hw]
    return out3d.reshape(n, c_out, h, w)


def xavier_uniform_conv_weight(key, channels):
    """Deterministic xavier_uniform init for a (C, C, 1, 1) conv weight."""
    fan_in = channels * 1 * 1
    fan_out = channels * 1 * 1
    bound = jnp.sqrt(6.0 / (fan_in + fan_out))
    return jax.random.uniform(
        key, (channels, channels, 1, 1), minval=-bound, maxval=bound,
        dtype=jnp.float32,
    )


if __name__ == "__main__":
    key = jax.random.PRNGKey(0)
    k_x, k_w = jax.random.split(key)

    N, C, H, W = 2, 4, 16, 16
    x = jax.random.normal(k_x, (N, C, H, W), dtype=jnp.float32)
    weights = xavier_uniform_conv_weight(k_w, C)

    out = jax.jit(channel_attention_forward)(x, weights)
    out = jax.block_until_ready(out)

    # Reference check against plain-JAX 1x1 conv (einsum over channels).
    ref = jnp.einsum("nchw,oc->nohw", x, weights.reshape(C, C))
    assert out.shape == (N, C, H, W)
    assert jnp.allclose(out, ref, atol=1e-5, rtol=1e-5)

    print("KERNEL_OK")
</pallas_src>

<mosaic_0001>
module attributes {stable_mosaic.version = 11 : i64} {
  func.func @_channel_attn_kernel(%arg0: i32, %arg1: i32, %arg2: memref<4x4xf32, #tpu.memory_space<vmem>>, %arg3: memref<1x4x256xf32, #tpu.memory_space<vmem>>, %arg4: memref<1x4x256xf32, #tpu.memory_space<vmem>>) attributes {dimension_semantics = [#tpu.dimension_semantics<parallel>, #tpu.dimension_semantics<parallel>], iteration_bounds = array<i64: 2, 1>, scalar_prefetch = 0 : i64, scratch_operands = 0 : i64, tpu.core_type = #tpu.core_type<tc>, window_params = [{pipeline_mode = #tpu.pipeline_mode<synchronous>, transform_indices = @transform_0, window_bounds = array<i64: 4, 4>}, {transform_indices = @transform_1, window_bounds = array<i64: 1, 4, 256>}, {transform_indices = @transform_2, window_bounds = array<i64: 1, 4, 256>}]} {
    %c0 = arith.constant 0 : index
    %c0_0 = arith.constant 0 : index
    %0 = vector.load %arg2[%c0, %c0_0] : memref<4x4xf32, #tpu.memory_space<vmem>>, vector<4x4xf32>
    %c0_1 = arith.constant 0 : index
    %c0_2 = arith.constant 0 : index
    %c0_3 = arith.constant 0 : index
    %1 = vector.load %arg3[%c0_1, %c0_2, %c0_3] : memref<1x4x256xf32, #tpu.memory_space<vmem>>, vector<1x4x256xf32>
    %2 = vector.shape_cast %1 : vector<1x4x256xf32> to vector<4x256xf32>
    %cst = arith.constant dense<0.000000e+00> : vector<4x256xf32>
    %3 = tpu.matmul %0, %2, %cst {dimension_numbers = #tpu.dot_dimension_numbers<[1], [0], [0], [1], [0, 0, 1, 1], [], []>} : vector<4x4xf32>, vector<4x256xf32>, vector<4x256xf32> -> vector<4x256xf32>
    %c0_4 = arith.constant 0 : index
    %c0_5 = arith.constant 0 : index
    %c0_6 = arith.constant 0 : index
    %4 = vector.load %arg4[%c0_4, %c0_5, %c0_6] : memref<1x4x256xf32, #tpu.memory_space<vmem>>, vector<1x4x256xf32>
    %5 = vector.shape_cast %4 : vector<1x4x256xf32> to vector<4x256xf32>
    %6 = vector.shape_cast %3 : vector<4x256xf32> to vector<1x4x256xf32>
    tpu.vector_store %arg4[%c0_4, %c0_5, %c0_6], %6 {strides = array<i32>} : memref<1x4x256xf32, #tpu.memory_space<vmem>>, vector<1x4x256xf32>,
    return
  }
  func.func @transform_0(%arg0: i32, %arg1: i32) -> (i32, i32) {
    %c0_i32 = arith.constant 0 : i32
    %c0_i32_0 = arith.constant 0 : i32
    %c0_i32_1 = arith.constant 0 : i32
    return %c0_i32, %c0_i32_0 : i32, i32
  }
  func.func @transform_1(%arg0: i32, %arg1: i32) -> (i32, i32, i32) {
    %c0_i32 = arith.constant 0 : i32
    %c0_i32_0 = arith.constant 0 : i32
    return %arg0, %c0_i32, %arg1 : i32, i32, i32
  }
  func.func @transform_2(%arg0: i32, %arg1: i32) -> (i32, i32, i32) {
    %c0_i32 = arith.constant 0 : i32
    %c0_i32_0 = arith.constant 0 : i32
    return %arg0, %c0_i32, %arg1 : i32, i32, i32
  }
}

</mosaic_0001>

<bundles_post_ra>
// kernel: channel_attention_forward.1
= control target key start
LH: loop header
LB: loop body
LE: loop exit
PB: predicated region body
PF: predicated region fallthrough
CT: control target
= control target key end

     0   :  { %s441_s9 = smov 0   ;;  %s443_s10 = smov 0   ;;  %s474_s0 = inlined_call_operand.vmem [shape: f32[4,4], index: 0, kind: input, shape index: {}]   ;;  %s475_s1 = inlined_call_operand.vmem [shape: f32[2,4,256], index: 1, kind: input, shape index: {}]   ;;  %s476_s2 = inlined_call_operand.vmem [shape: f32[2,4,256], index: 2, kind: output, shape index: {}]  }
   0x1   :  { %s445_s11 = smov 0  }
   0x2 LB: > { %s24_s12 = sadd.s32 1, %s419_s10  ;;  %p363_p0 = scmp.ge.s32.totalorder %s423_s11, 1  ;;  %s423_s11 = sphi %s445_s11, %s12_s11   ;;  %s419_s10 = sphi %s443_s10, %s478_s10   ;;  %s415_s9 = sphi %s441_s9, %s477_s9  }
   0x3   : > { %p26_p1 = scmp.ge.s32.totalorder %s24_s12, 2  ;;  %p133_p2 = scmp.lt.s32.totalorder %s423_s11, 3 }
   0x5   : > { %s480_s12 = smov (%p26_p1, %s24_s12), 0  ;;  %p134_p3 = pnand %p363_p0, %p133_p2 }
   0x6   : > { %p164_p4 = scmp.lt.s32.totalorder (!%p134_p3), %s415_s9, 1  ;;  %v425_v0 = vmov (!%p134_p3), 0.0   ;;  %vm191_vm0 = vcmask (!%p134_p3), 1043456   ;;  %v183_v3 = vld [vmem:[%s474_s0] sm:$0xf] (!%p134_p3)  ;;  %vm187_vm1 = vcmask (!%p134_p3), 31744  }
   0x7   : > { %137 = sbr.rel (%p134_p3) target bundleno = 238 (0xee), region = 28  ;;  %260 = vmatprep.mubr.f32.mxu0 (!%p134_p3), %v425_v0 }
   0xe   : > { %s482_s9 = smov (!%p164_p4, %s415_s9), 1 }
   0xf   : > { %s373_s13 = sshll.u32 %s482_s9, 3 }
  0x10   : > { %s171_s16 = scalar_lea.vmem %s475_s1, %s373_s13  ;;  %s181_s21 = scalar_lea.vmem %s476_s2, %s373_s13 }
  0x11   : > { %v184_v1 = vld [vmem:[%s171_s16] sm:$0xff] }
  0x12   : > { %v186_v2 = vcombine.high %v184_v1, %v184_v1 }
  0x14   : > { %368 = vmatprep.subr.msk.mxu0 %vm191_vm0, %v186_v2 }
  0x15   : > { %369 = vmatpush1.msk.msra.mxu0 %vm191_vm0, %v184_v1 }
  0x16   : > { %370 = vmatmul.mubr.msk.f32.vlgmr.msra.gmra.mrb[0].mxu0 %vm187_vm1, %v183_v3 }
  0xe9   : > { %v262_v4 = vpop.f32.mrb[0].mxu0 }
  0xea   : > { %v264_v5 = vpop.f32.mrb[1].mxu0 }
  0xeb   : > { %v269_v6 = vcombine.low %v262_v4, %v264_v5 }
  0xed   : > { %271 = vst [vmem:[%s181_s21] sm:$0xff] %v269_v6 }
  0xee PF: > { %s12_s11 = sadd.s32 1, %s423_s11   ;;  %s477_s9 = smov %s419_s10 }
  0xef   : > { %p9_p5 = scmp.ge.s32.totalorder %s12_s11, 4   ;;  %s478_s10 = smov %s480_s12 }
  0xf1   :  { %11 = sbr.rel (!%p9_p5) target bundleno = 2 (0x2), region = 58 }

</bundles_post_ra>
